<compile_context>
chip_gen: v7x
topology: tpu7x:2x2x1
jax: 0.10.0
libtpu: 0.0.40
codegen_flags: <defaults>
</compile_context>

<pallas_src>
import math

import jax
import jax.numpy as jnp
from jax.experimental import pallas as pl
from jax.experimental.pallas import tpu as pltpu


# ------------------------------------------------------------------ small helpers

def _round_up(a, b):
    return (a + b - 1) // b * b


def _largest_divisor_leq(n, cap):
    cap = max(1, min(n, cap))
    for d in range(cap, 0, -1):
        if n % d == 0:
            return d
    return 1


def _vmem_tile_bytes(shape, itemsize):
    """Conservative VMEM footprint of one block (minor dim padded to 128, 2nd-minor to 8)."""
    if len(shape) == 1:
        padded = (_round_up(shape[0], 128),)
    else:
        padded = (*shape[:-2], _round_up(shape[-2], 8), _round_up(shape[-1], 128))
    n = 1
    for s in padded:
        n *= s
    return n * itemsize


# ------------------------------------------------------------------ kernels

def _fullseq_kernel(x_ref, w_ref, pe_ref, o_ref):
    """Block = (TB, L, C): whole sequence resident -> circular taps built in-kernel."""
    tb, seq_len, _ = x_ref.shape
    w0 = w_ref[0].astype(jnp.float32)          # multiplies x[t-1]  (conv tap k=0)
    w1 = w_ref[1].astype(jnp.float32)          # multiplies x[t]    (conv tap k=1)
    w2 = w_ref[2].astype(jnp.float32)          # multiplies x[t+1]  (conv tap k=2)
    pe_f32 = pe_ref[...].astype(jnp.float32)   # (L, D)
    for b in range(tb):                        # tb is static & small (VMEM-bounded)
        xb = x_ref[b].astype(jnp.float32)                       # (L, C)
        x_prev = pltpu.roll(xb, shift=1, axis=0)                # x[(t-1) % L]
        x_next = pltpu.roll(xb, shift=seq_len - 1, axis=0)      # x[(t+1) % L]
        acc = jnp.dot(x_prev, w0, preferred_element_type=jnp.float32)
        acc += jnp.dot(xb, w1, preferred_element_type=jnp.float32)
        acc += jnp.dot(x_next, w2, preferred_element_type=jnp.float32)
        # Dropout(p=0.05) is identity at inference.
        # TODO(synk): training-mode dropout (pltpu.prng_seed / prng_random_bits) not implemented.
        o_ref[b] = (acc + pe_f32).astype(o_ref.dtype)


def _tiled_kernel(xp_ref, x_ref, xn_ref, w_ref, pe_ref, o_ref):
    """Fallback for sequences too long for a whole-L block: taps precomputed in wrapper."""
    w0 = w_ref[0].astype(jnp.float32)
    w1 = w_ref[1].astype(jnp.float32)
    w2 = w_ref[2].astype(jnp.float32)
    pe_f32 = pe_ref[...].astype(jnp.float32)
    acc = jnp.dot(xp_ref[0].astype(jnp.float32), w0, preferred_element_type=jnp.float32)
    acc += jnp.dot(x_ref[0].astype(jnp.float32), w1, preferred_element_type=jnp.float32)
    acc += jnp.dot(xn_ref[0].astype(jnp.float32), w2, preferred_element_type=jnp.float32)
    o_ref[0] = (acc + pe_f32).astype(o_ref.dtype)


# ------------------------------------------------------------------ wrapper

def data_embedding(x, conv_weight, pe, *, stream_dtype=jnp.bfloat16,
                   vmem_block_budget=16 * 1024 * 1024):
    """Forward pass of MTFAE DataEmbedding.

    x           : (B, L, C) activations.
    conv_weight : (D, C, 3) PyTorch Conv1d weight (out_channels, in_channels, kernel).
    pe          : (max_len, D) sinusoidal positional-embedding table, max_len >= L.
    Returns (B, L, D) in x.dtype.
    """
    B, L, C = x.shape
    D, C_w, K = conv_weight.shape
    assert C_w == C and K == 3, "conv_weight must be (d_model, c_in, 3)"
    assert pe.shape[0] >= L and pe.shape[1] == D, "pe table too short / wrong width for L, D"

    out_dtype = x.dtype
    sdt = jnp.dtype(stream_dtype) if stream_dtype is not None else jnp.dtype(x.dtype)
    bs, bo = sdt.itemsize, jnp.dtype(out_dtype).itemsize

    # (D, C, 3) -> (3, C, D): tap k=0 multiplies x[t-1], k=1 x[t], k=2 x[t+1]
    w = jnp.transpose(conv_weight, (2, 1, 0)).astype(sdt)     # (3, C, D)
    pe_l = pe[:L].astype(sdt)                                 # (L, D)
    x_s = x.astype(sdt)

    vmem_limit = 32 * 1024 * 1024  # safe on v5e/v6e/v7x (<= physical VMEM everywhere)

    # ---------------- primary path: whole sequence per block, batch tiled ----------------
    def fullseq_bytes(tb):
        blocks = 2 * (_vmem_tile_bytes((tb, L, C), bs)          # double-buffered inputs/outputs
                      + _vmem_tile_bytes((L, D), bs)
                      + _vmem_tile_bytes((3, C, D), bs)
                      + _vmem_tile_bytes((tb, L, D), bo))
        temps = (3 * _vmem_tile_bytes((1, L, C), 4)             # f32 x + two rolled taps
                 + 2 * _vmem_tile_bytes((1, L, D), 4))          # f32 accumulator + result
        return blocks + temps

    # Largest batch tile (divisor of B) within the VMEM budget; keep >= 2 grid steps when
    # B >= 2 so both v7x TensorCores get work (no effect on single-TC v5e/v6e).
    tb_cap = B if B < 2 else max(1, B // 2)
    tb = _largest_divisor_leq(B, tb_cap)
    while tb > 1 and fullseq_bytes(tb) > vmem_block_budget:
        tb = _largest_divisor_leq(B, tb - 1)

    if fullseq_bytes(tb) <= vmem_block_budget:
        return pl.pallas_call(
            _fullseq_kernel,
            out_shape=jax.ShapeDtypeStruct((B, L, D), out_dtype),
            grid=(B // tb,),
            in_specs=[
                pl.BlockSpec((tb, L, C), lambda b: (b, 0, 0)),
                pl.BlockSpec((3, C, D), lambda b: (0, 0, 0)),
                pl.BlockSpec((L, D), lambda b: (0, 0)),
            ],
            out_specs=pl.BlockSpec((tb, L, D), lambda b: (b, 0, 0)),
            compiler_params=pltpu.CompilerParams(
                dimension_semantics=("parallel",),
                vmem_limit_bytes=vmem_limit,
            ),
        )(x_s, w, pe_l)

    # ---------------- fallback: sequence tiled (whole-L block does not fit VMEM) ----------
    # Circular neighbour taps are materialised once in the wrapper (no concat) so the kernel
    # stays a pure streamed matmul; L is padded up to a multiple of the sublane-aligned tile.
    x_prev = jnp.roll(x_s, 1, axis=1)
    x_next = jnp.roll(x_s, -1, axis=1)

    def tiled_bytes(tl):
        blocks = 2 * (3 * _vmem_tile_bytes((1, tl, C), bs)
                      + _vmem_tile_bytes((tl, D), bs)
                      + _vmem_tile_bytes((3, C, D), bs)
                      + _vmem_tile_bytes((1, tl, D), bo))
        temps = 3 * _vmem_tile_bytes((1, tl, C), 4) + 2 * _vmem_tile_bytes((1, tl, D), 4)
        return blocks + temps

    tl = max(8, _round_up(min(L, 512), 8))
    while tl > 8 and tiled_bytes(tl) > vmem_block_budget:
        tl -= 8
    lp = _round_up(L, tl)
    pad = lp - L
    if pad:
        x_prev = jnp.pad(x_prev, ((0, 0), (0, pad), (0, 0)))
        x_cur = jnp.pad(x_s, ((0, 0), (0, pad), (0, 0)))
        x_next = jnp.pad(x_next, ((0, 0), (0, pad), (0, 0)))
        pe_pad = jnp.pad(pe_l, ((0, pad), (0, 0)))
    else:
        x_cur, pe_pad = x_s, pe_l

    tap_spec = pl.BlockSpec((1, tl, C), lambda l, b: (b, l, 0))
    out = pl.pallas_call(
        _tiled_kernel,
        out_shape=jax.ShapeDtypeStruct((B, lp, D), out_dtype),
        grid=(lp // tl, B),  # batch innermost -> pe / weight blocks stay resident
        in_specs=[
            tap_spec, tap_spec, tap_spec,
            pl.BlockSpec((3, C, D), lambda l, b: (0, 0, 0)),
            pl.BlockSpec((tl, D), lambda l, b: (l, 0)),
        ],
        out_specs=pl.BlockSpec((1, tl, D), lambda l, b: (b, l, 0)),
        compiler_params=pltpu.CompilerParams(
            dimension_semantics=("parallel", "parallel"),
            vmem_limit_bytes=vmem_limit,
        ),
    )(x_prev, x_cur, x_next, w, pe_pad)
    return out[:, :L, :]


# ------------------------------------------------------------------ module helpers / reference

def make_positional_embedding(d_model, max_len=5000):
    assert d_model % 2 == 0, "d_model must be even (matches PyTorch PositionalEmbedding)"
    position = jnp.arange(0, max_len, dtype=jnp.float32)[:, None]             # (max_len, 1)
    div_term = jnp.exp(jnp.arange(0, d_model, 2, dtype=jnp.float32)
                       * (-math.log(10000.0) / d_model))                      # (d_model/2,)
    pe = jnp.zeros((max_len, d_model), dtype=jnp.float32)
    pe = pe.at[:, 0::2].set(jnp.sin(position * div_term))
    pe = pe.at[:, 1::2].set(jnp.cos(position * div_term))
    return pe


def reference(x, conv_weight, pe):
    """Pure-JAX reference for the same forward (circular conv1d + pos emb)."""
    L = x.shape[1]
    x_prev = jnp.roll(x, shift=1, axis=1)
    x_next = jnp.roll(x, shift=-1, axis=1)
    w0 = conv_weight[:, :, 0].T  # (C, D)
    w1 = conv_weight[:, :, 1].T
    w2 = conv_weight[:, :, 2].T
    out = x_prev @ w0 + x @ w1 + x_next @ w2
    return out + pe[:L][None, :, :]


if __name__ == "__main__":
    B, L, C, D = 2, 16, 4, 32

    key = jax.random.PRNGKey(0)
    kx, kw = jax.random.split(key)

    x = jax.random.normal(kx, (B, L, C), dtype=jnp.float32)

    # Conv1d weight (d_model, c_in, 3), kaiming_normal_(fan_in, leaky_relu) init:
    fan_in = C * 3
    gain = math.sqrt(2.0 / (1.0 + 0.01 ** 2))
    std = gain / math.sqrt(fan_in)
    conv_weight = std * jax.random.normal(kw, (D, C, 3), dtype=jnp.float32)

    pe = make_positional_embedding(D, max_len=5000)

    out = jax.block_until_ready(data_embedding(x, conv_weight, pe))

    # Tight check against a reference fed the same bf16-quantised streams (kernel streams
    # x / w / pe in bf16, accumulates in f32), plus a looser sanity check vs pure f32.
    q = lambda a: a.astype(jnp.bfloat16).astype(jnp.float32)
    ref_q = reference(q(x), q(conv_weight), q(pe))
    ref_f32 = reference(x, conv_weight, pe)

    assert out.shape == (B, L, D)
    assert out.dtype == x.dtype
    assert jnp.allclose(out, ref_q, atol=1e-4, rtol=1e-4), "mismatch vs bf16-stream reference"
    assert jnp.allclose(out, ref_f32, atol=5e-2, rtol=5e-2), "mismatch vs f32 reference"

    print("KERNEL_OK")
</pallas_src>

<mosaic_0001>
module attributes {stable_mosaic.version = 11 : i64} {
  func.func @_fullseq_kernel(%arg0: i32, %arg1: memref<1x16x4xbf16, #tpu.memory_space<vmem>>, %arg2: memref<3x4x32xbf16, #tpu.memory_space<vmem>>, %arg3: memref<16x32xbf16, #tpu.memory_space<vmem>>, %arg4: memref<1x16x32xf32, #tpu.memory_space<vmem>>) attributes {dimension_semantics = [#tpu.dimension_semantics<parallel>], iteration_bounds = array<i64: 2>, scalar_prefetch = 0 : i64, scratch_operands = 0 : i64, tpu.core_type = #tpu.core_type<tc>, window_params = [{transform_indices = @transform_0, window_bounds = array<i64: 1, 16, 4>}, {pipeline_mode = #tpu.pipeline_mode<synchronous>, transform_indices = @transform_1, window_bounds = array<i64: 3, 4, 32>}, {pipeline_mode = #tpu.pipeline_mode<synchronous>, transform_indices = @transform_2, window_bounds = array<i64: 16, 32>}, {transform_indices = @transform_3, window_bounds = array<i64: 1, 16, 32>}]} {
    %c0 = arith.constant 0 : index
    %c0_0 = arith.constant 0 : index
    %c0_1 = arith.constant 0 : index
    %0 = vector.load %arg2[%c0, %c0_0, %c0_1] : memref<3x4x32xbf16, #tpu.memory_space<vmem>>, vector<1x4x32xbf16>
    %1 = vector.shape_cast %0 : vector<1x4x32xbf16> to vector<4x32xbf16>
    %2 = arith.extf %1 : vector<4x32xbf16> to vector<4x32xf32>
    %c1 = arith.constant 1 : index
    %c0_2 = arith.constant 0 : index
    %c0_3 = arith.constant 0 : index
    %3 = vector.load %arg2[%c1, %c0_2, %c0_3] : memref<3x4x32xbf16, #tpu.memory_space<vmem>>, vector<1x4x32xbf16>
    %4 = vector.shape_cast %3 : vector<1x4x32xbf16> to vector<4x32xbf16>
    %5 = arith.extf %4 : vector<4x32xbf16> to vector<4x32xf32>
    %c2 = arith.constant 2 : index
    %c0_4 = arith.constant 0 : index
    %c0_5 = arith.constant 0 : index
    %6 = vector.load %arg2[%c2, %c0_4, %c0_5] : memref<3x4x32xbf16, #tpu.memory_space<vmem>>, vector<1x4x32xbf16>
    %7 = vector.shape_cast %6 : vector<1x4x32xbf16> to vector<4x32xbf16>
    %8 = arith.extf %7 : vector<4x32xbf16> to vector<4x32xf32>
    %c0_6 = arith.constant 0 : index
    %c0_7 = arith.constant 0 : index
    %9 = vector.load %arg3[%c0_6, %c0_7] : memref<16x32xbf16, #tpu.memory_space<vmem>>, vector<16x32xbf16>
    %10 = arith.extf %9 : vector<16x32xbf16> to vector<16x32xf32>
    %c0_8 = arith.constant 0 : index
    %c0_9 = arith.constant 0 : index
    %c0_10 = arith.constant 0 : index
    %11 = vector.load %arg1[%c0_8, %c0_9, %c0_10] : memref<1x16x4xbf16, #tpu.memory_space<vmem>>, vector<1x16x4xbf16>
    %12 = vector.shape_cast %11 : vector<1x16x4xbf16> to vector<16x4xbf16>
    %13 = arith.extf %12 : vector<16x4xbf16> to vector<16x4xf32>
    %c1_i32 = arith.constant 1 : i32
    %14 = tpu.dynamic_rotate %13 by %c1_i32 dim 0 : vector<16x4xf32>, i32 -> vector<16x4xf32>
    %c15_i32 = arith.constant 15 : i32
    %15 = tpu.dynamic_rotate %13 by %c15_i32 dim 0 : vector<16x4xf32>, i32 -> vector<16x4xf32>
    %cst = arith.constant dense<0.000000e+00> : vector<16x32xf32>
    %16 = tpu.matmul %14, %2, %cst {dimension_numbers = #tpu.dot_dimension_numbers<[1], [0], [0], [1], [0, 0, 1, 1], [], []>} : vector<16x4xf32>, vector<4x32xf32>, vector<16x32xf32> -> vector<16x32xf32>
    %cst_11 = arith.constant dense<0.000000e+00> : vector<16x32xf32>
    %17 = tpu.matmul %13, %5, %cst_11 {dimension_numbers = #tpu.dot_dimension_numbers<[1], [0], [0], [1], [0, 0, 1, 1], [], []>} : vector<16x4xf32>, vector<4x32xf32>, vector<16x32xf32> -> vector<16x32xf32>
    %18 = arith.addf %16, %17 : vector<16x32xf32>
    %cst_12 = arith.constant dense<0.000000e+00> : vector<16x32xf32>
    %19 = tpu.matmul %15, %8, %cst_12 {dimension_numbers = #tpu.dot_dimension_numbers<[1], [0], [0], [1], [0, 0, 1, 1], [], []>} : vector<16x4xf32>, vector<4x32xf32>, vector<16x32xf32> -> vector<16x32xf32>
    %20 = arith.addf %18, %19 : vector<16x32xf32>
    %21 = arith.addf %20, %10 : vector<16x32xf32>
    %c0_13 = arith.constant 0 : index
    %c0_14 = arith.constant 0 : index
    %c0_15 = arith.constant 0 : index
    %22 = vector.load %arg4[%c0_13, %c0_14, %c0_15] : memref<1x16x32xf32, #tpu.memory_space<vmem>>, vector<1x16x32xf32>
    %23 = vector.shape_cast %22 : vector<1x16x32xf32> to vector<16x32xf32>
    %24 = vector.shape_cast %21 : vector<16x32xf32> to vector<1x16x32xf32>
    tpu.vector_store %arg4[%c0_13, %c0_14, %c0_15], %24 {strides = array<i32>} : memref<1x16x32xf32, #tpu.memory_space<vmem>>, vector<1x16x32xf32>,
    return
  }
  func.func @transform_0(%arg0: i32) -> (i32, i32, i32) {
    %c0_i32 = arith.constant 0 : i32
    %c0_i32_0 = arith.constant 0 : i32
    %c0_i32_1 = arith.constant 0 : i32
    return %arg0, %c0_i32, %c0_i32_0 : i32, i32, i32
  }
  func.func @transform_1(%arg0: i32) -> (i32, i32, i32) {
    %c0_i32 = arith.constant 0 : i32
    %c0_i32_0 = arith.constant 0 : i32
    %c0_i32_1 = arith.constant 0 : i32
    %c0_i32_2 = arith.constant 0 : i32
    return %c0_i32, %c0_i32_0, %c0_i32_1 : i32, i32, i32
  }
  func.func @transform_2(%arg0: i32) -> (i32, i32) {
    %c0_i32 = arith.constant 0 : i32
    %c0_i32_0 = arith.constant 0 : i32
    %c0_i32_1 = arith.constant 0 : i32
    return %c0_i32, %c0_i32_0 : i32, i32
  }
  func.func @transform_3(%arg0: i32) -> (i32, i32, i32) {
    %c0_i32 = arith.constant 0 : i32
    %c0_i32_0 = arith.constant 0 : i32
    %c0_i32_1 = arith.constant 0 : i32
    return %arg0, %c0_i32, %c0_i32_0 : i32, i32, i32
  }
}

</mosaic_0001>

<bundles_post_ra>
// kernel: tpu_custom_call.1
= control target key start
LH: loop header
LB: loop body
LE: loop exit
PB: predicated region body
PF: predicated region fallthrough
CT: control target
= control target key end

     0   :  { %8 = vsyncpa [#allocation3], 0  ;;  %s850_s0 = inlined_call_operand.vmem [shape: bf16[2,16,4], index: 0, kind: input, shape index: {}]   ;;  %s851_s1 = inlined_call_operand.vmem [shape: bf16[3,4,32], index: 1, kind: input, shape index: {}]   ;;  %s852_s2 = inlined_call_operand.vmem [shape: bf16[16,32], index: 2, kind: input, shape index: {}]   ;;  %s853_s3 = inlined_call_operand.hbm [shape: f32[2,16,32], index: 3, kind: output, shape index: {}]  }
   0x1   :  { %10 = vsyncpa [#allocation3 + $0x1], 0  ;;  %s723_s12 = smov 0   ;;  %s725_s13 = smov 0  }
   0x2   :  { %s727_s14 = smov 0   ;;  %s729_s15 = smov 0  }
   0x3 LB: > { %s744_s16 = sadd.s32 4294967295, %s698_s15   ;;  %s534_s17 = sadd.s32 4294967294, %s698_s15   ;;  %s698_s15 = sphi %s729_s15, %s859_s15   ;;  %s694_s14 = sphi %s727_s14, %s858_s14   ;;  %s690_s13 = sphi %s725_s13, %s857_s13   ;;  %s686_s12 = sphi %s723_s12, %s856_s12  }
   0x4   : > { %s748_s18 = sadd.s32 1, %s698_s15   ;;  %s91_s19 = sadd.s32 1, %s694_s14 }
   0x5   : > { %s88_s20 = ssub.s32 %s698_s15, %s748_s18  ;;  %p101_p0 = scmp.ne.s32.totalorder %s694_s14, %s690_s13 }
   0x6   : > { %p89_p1 = scmp.eq.s32.totalorder %s88_s20, 0  ;;  %p102_p2 = scmp.eq.s32.totalorder %s744_s16, 1 }
   0x7   : > { %p107_p3 = scmp.ne.s32.totalorder %s690_s13, %s686_s12  ;;  %p108_p4 = scmp.eq.s32.totalorder %s534_s17, 1 }
   0x8   : > { %s759_s21 = scalar_select %p89_p1, %s694_s14, %s91_s19  }
   0x9   : > { %p761_p5 = por %p102_p2, %p101_p0  ;;  %p765_p6 = por %p108_p4, %p107_p3 }
   0xa   : > { %p537_p7 = scmp.ge.s32.totalorder %s698_s15, 1  ;;  %p140_p8 = scmp.lt.s32.totalorder %s698_s15, 3 }
   0xc   : > { %p141_p9 = pnand %p537_p7, %p140_p8 }
   0xd   : > { %v169_v0 = vld [vmem:[%s851_s1] sm:$0x3] (!%p141_p9)  ;;  %vm204_vm0 = vcmask (!%p141_p9), 1043456   ;;  %p164_p10 = scmp.lt.s32.totalorder (!%p141_p9), %s744_s16, 1  ;;  %v187_v1 = vlaneseq (!%p141_p9)  ;;  %v542_v3 = vld [vmem:[%s851_s1 + $0x4] sm:$0x3] (!%p141_p9) }
   0xe   : > { %144 = sbr.rel (%p141_p9) target bundleno = 272 (0x110), region = 32  ;;  %v170_v2 = vunpack.c.l.bf16 (!%p141_p9), %v169_v0  ;;  %v541_v4 = vld [vmem:[%s851_s1 + $0x2] sm:$0x3] (!%p141_p9)  ;;  %v176_v5 = vunpack.c.l.bf16 (!%p141_p9), %v542_v3  ;;  %vm197_vm2 = vcmask (!%p141_p9), 31744   ;;  %s161_s8 = sand.u32 (!%p141_p9), 1, %s690_s13   ;;  %vm455_vm4 = vcmask (!%p141_p9), 261120  }
   0xf   : > { %v173_v6 = vunpack.c.l.bf16 (!%p141_p9), %v541_v4  ;;  %v188_v7 = vshrl.u32 (!%p141_p9), %v187_v1, 7  ;;  %s538_s9 = sshll.u32 (!%p141_p9), %s161_s8, 4  ;;  %v560_v21 = vld [vmem:[%s852_s2] sm:$0xff] (!%p141_p9)   ;;  %s558_s20 = sshll.u32 (!%p141_p9), %s744_s16, 8 }
  0x10   : > { %581 = vmatprep.subr.msk.mxu0 (!%p141_p9), %vm204_vm0, %v170_v2  ;;  %v562_v22 = vunpack.c.h.bf16 (!%p141_p9), %v560_v21  ;;  %s163_s17 = scalar_lea.vmem (!%p141_p9), [#allocation2], %s538_s9  ;;  %v561_v24 = vunpack.c.l.bf16 (!%p141_p9), %v560_v21  ;;  %s805_s26 = scalar_lea.hbm (!%p141_p9), %s853_s3, %s558_s20 }
  0x11   : > { %582 = vmatpush3.msk.msra.mxu0 (!%p141_p9), %vm204_vm0, %v170_v2  ;;  %576 = vmatprep.subr.msk.mxu1 (!%p141_p9), %vm204_vm0, %v173_v6  ;;  %vm189_vm1 = vcmp.lt.s32.totalorder (!%p141_p9), %v188_v7, 1  ;;  %vm194_vm3 = vcmp.lt.s32.totalorder (!%p141_p9), %v188_v7, 7  ;;  %s472_s19 = sshll.u32 (!%p141_p9), %s163_s17, 4  ;;  %s809_s27 = scalar_lea.sflag (!%p141_p9), [#allocation3], %s161_s8  ;;  %s807_s19 = int_to_ptr.vmem [resolvable:$true] %s472_s19 }
  0x12   : > { %586 = vmatprep.subr.msk.mxu0 (!%p141_p9), %vm204_vm0, %v176_v5  ;;  %577 = vmatpush3.msk.msra.mxu1 (!%p141_p9), %vm204_vm0, %v173_v6  ;;  %s700_s28 = smov (!%p141_p9), [#allocation2]  }
  0x13   : > { %s640_s29 = sshll.u32 (!%p141_p9), %s700_s28, 4  ;;  %s641_s29 = int_to_ptr.vmem [resolvable:$false] %s640_s29 }
  0x14   : > { %p643_p0 = scmp.lt.s32.totalorder (!%p141_p9), %s807_s19, %s641_s29 }
  0x15   : > { %s165_s30 = scalar_select %p164_p10, %s744_s16, 1 }
  0x16   : > { %s636_s16 = scalar_lea.vmem %s807_s19, 256 }
  0x17   : > { %s557_s4 = sshll.u32 %s165_s30, 3  ;;  %p637_p11 = scmp.ne.s32.totalorder %s807_s19, %s636_s16 }
  0x18   : > { %s168_s7 = scalar_lea.vmem %s850_s0, %s557_s4  ;;  %s642_s30 = scalar_lea.vmem %s641_s29, 512 }
  0x19   : > { %v564_v8 = vld [vmem:[%s168_s7] sm:$0xff]   ;;  %p638_p12 = pnand %p637_p11, %p761_p5  ;;  %p644_p1 = scmp.lt.s32.totalorder %s642_s30, %s636_s16 }
  0x1a   : > { %v565_v9 = vunpack.c.l.bf16 %v564_v8  ;;  %v566_v10 = vunpack.c.h.bf16 %v564_v8 }
  0x1b   : > { %p639_p13 = pneg %p638_p12  ;;  %p645_p2 = por %p644_p1, %p643_p0 }
  0x1c   : > { %v185_v11 = vrot.slane %v565_v9, 7  ;;  %v186_v12 = vrot.slane %v566_v10, 7  ;;  %578 = vmatprep.mubr.msk.f32.mxu1 %vm197_vm2, %v565_v9  ;;  %v192_v13 = vrot.slane %v565_v9, 1  ;;  %v193_v14 = vrot.slane %v566_v10, 1 }
  0x1d   : > { %579 = vmatmul.mubr.msk.f32.vlgmr.msra.gmra.mrb[0].mxu1 %vm197_vm2, %v566_v10  ;;  %p646_p3 = pnand %p645_p2, %p639_p13 }
  0x1e   : > { %v191_v15 = vsel %vm189_vm1, %v186_v12, %v185_v11  ;;  %v190_v16 = vsel %vm189_vm1, %v185_v11, %v186_v12  ;;  %v195_v17 = vsel %vm194_vm3, %v192_v13, %v193_v14  ;;  %v196_v18 = vsel %vm194_vm3, %v193_v14, %v192_v13 }
  0x1f   : > { %583 = vmatprep.mubr.msk.f32.mxu0 %vm197_vm2, %v191_v15 }
  0x20   : > { %584 = vmatmul.mubr.msk.f32.vlgmr.msra.gmra.mrb[0].mxu0 %vm197_vm2, %v190_v16 }
  0x21   : > { %587 = vmatpush3.msk.msra.mxu0 %vm204_vm0, %v176_v5  ;;  %588 = vmatprep.mubr.msk.f32.mxu0 %vm197_vm2, %v195_v17 }
  0x28   : > { %589 = vmatmul.mubr.msk.f32.vlgmr.msra.gmra.mrb[0].mxu0 %vm197_vm2, %v196_v18 }
  0xf0   : > { %v580_v19 = vpop.f32.mrb[0].mxu1 }
  0xf1   : > { %v274_v20 = vpop.f32.mrb[1].mxu1 }
  0xfb   : > { %v590_v23 = vpop.f32.mrb[0].mxu0 }
  0xfc   : > { %v591_v25 = vadd.f32 %v590_v23, %v580_v19  ;;  %v442_v26 = vpop.f32.mrb[1].mxu0 }
  0xfd   : > { %v592_v27 = vadd.f32 %v442_v26, %v274_v20 }
  0xfe   : > { %v454_v28 = vadd.f32 %v591_v25, %v562_v22 }
  0xff   : > { %v453_v29 = vadd.f32 %v592_v27, %v561_v24 }
 0x100   : > { %457 = vst.msk [vmem:[%s163_s17 + $0x8] sm:$0xff] %vm455_vm4, %v454_v28 }
 0x101   : > { %456 = vst.msk [vmem:[%s163_s17] sm:$0xff] %vm455_vm4, %v453_v29 }
 0x102   : > { %649 = shalt.err (!%p646_p3)
}
 0x103   : > { %s650_s4 = scalar_lea.hbm %s805_s26, 256  ;;  %s654_s7 = scalar_lea.hbm %s853_s3, 512 }
 0x104   : > { %p651_p4 = scmp.ne.s32.totalorder %s805_s26, %s650_s4  ;;  %p655_p9 = scmp.lt.u32.totalorder %s805_s26, %s853_s3 }
 0x105   : > { %p656_p10 = scmp.lt.u32.totalorder %s654_s7, %s650_s4  ;;  %p658_p12 = scmp.lt.u32.totalorder %s650_s4, %s805_s26 }
 0x106   : > { %p652_p7 = pnand %p651_p4, %p761_p5 }
 0x107   : > { %p657_p11 = por %p656_p10, %p655_p9 }
 0x108   : > { %p653_p8 = pneg %p652_p7 }
 0x109   : > { %p659_p13 = por %p658_p12, %p657_p11 }
 0x10b   : > { %p660_p0 = pnand %p659_p13, %p653_p8 }
 0x10d   : > { %663 = shalt.err (!%p660_p0)
}
 0x10e   : > { %s701_s10 = smov 128   ;;  %s702_s11 = smov 8  }
 0x10f   : > { %595 = dma.vmem_to_hbm [thread:$0]  (%p761_p5), %s807_s19, 256, %s805_s26, %s809_s27, %s701_s10, %s701_s10, %s702_s11  }
 0x110 PF: > { %p601_p1 = scmp.ge.s32.totalorder %s698_s15, 2  ;;  %s487_s17 = sand.u32 1, %s686_s12  }
 0x111   : > { %s488_s20 = scalar_lea.sflag [#allocation3], %s487_s17 }
 0x112   : > { %p598_p2 = pnand %p601_p1, %p765_p6 }
 0x114   : > { %681 = dma.done.wait (!%p598_p2), %s488_s20, 256  }
 0x115   : > { %683 = vsyncadd (!%p598_p2), %s488_s20, 4294967040  ;;  %p13_p3 = scmp.ge.s32.totalorder %s748_s18, 4   ;;  %s856_s12 = smov %s690_s13 }
 0x116   : > { %s857_s13 = smov %s694_s14  ;;  %s858_s14 = smov %s759_s21 }
 0x117   : > { %s859_s15 = smov %s748_s18  ;;  %15 = sbr.rel (!%p13_p3) target bundleno = 3 (0x3), region = 69 }
 0x11e   :  { %493 = vsyncpa [#allocation3], 1 }
 0x11f   :  { %495 = vsyncpa [#allocation3 + $0x1], 1 }

</bundles_post_ra>
